<compile_context>
chip_gen: v5e
topology: v5e:2x2
jax: 0.10.0
libtpu: 0.0.40
codegen_flags: <defaults>
</compile_context>

<pallas_src>
import functools

import jax
import jax.numpy as jnp
from jax import lax
from jax.experimental import pallas as pl
from jax.experimental.pallas import tpu as pltpu


def _round_up(x, m):
    return ((x + m - 1) // m) * m


def _leaky_relu(x, slope=0.2):
    return jnp.where(x > 0, x, slope * x)


def discriminator_kernel(comp_ref, prop_ref,
                         w_comp_ref, w_prop_ref, b_in_ref,
                         w_hid_ref, b_hid_ref,
                         w_out_ref, b_out_ref,
                         o_ref, *, n_hidden_layers, mxu_dtype):
    # First block: torch.cat((comp, prop), -1) @ W_in.T + b is computed as a
    # split contraction (no lane-axis concatenation / relayout in the kernel).
    h = jnp.dot(comp_ref[...].astype(mxu_dtype), w_comp_ref[...],
                preferred_element_type=jnp.float32)
    h = h + jnp.dot(prop_ref[...].astype(mxu_dtype), w_prop_ref[...],
                    preferred_element_type=jnp.float32)
    h = h + b_in_ref[...]
    h = _leaky_relu(h)

    def hidden_layer(l, h):
        y = jnp.dot(h.astype(mxu_dtype), w_hid_ref[l],
                    preferred_element_type=jnp.float32) + b_hid_ref[l]
        return _leaky_relu(y)

    if n_hidden_layers <= 4:
        # Small L: full unroll (cheap, gives the scheduler full visibility).
        for l in range(n_hidden_layers):
            h = hidden_layer(l, h)
    else:
        # Large L: bound vreg live ranges — one layer's working set at a time.
        h = lax.fori_loop(0, n_hidden_layers, hidden_layer, h)

    y = jnp.dot(h.astype(mxu_dtype), w_out_ref[...],
                preferred_element_type=jnp.float32) + b_out_ref[...]
    o_ref[...] = jax.nn.sigmoid(y).astype(o_ref.dtype)


def make_discriminator_params(key, in_size, n_hidden_layers, hidden_size, out_size):
    """Deterministic PyTorch-Linear-style init: U(-1/sqrt(fan_in), 1/sqrt(fan_in)).
    Weights stored pre-transposed as (in_feat, out_feat)."""
    def linear(key, fan_in, fan_out):
        kw, kb = jax.random.split(key)
        bound = 1.0 / jnp.sqrt(fan_in)
        w = jax.random.uniform(kw, (fan_in, fan_out), jnp.float32, -bound, bound)
        b = jax.random.uniform(kb, (1, fan_out), jnp.float32, -bound, bound)
        return w, b

    keys = jax.random.split(key, n_hidden_layers + 2)
    w_in, b_in = linear(keys[0], in_size, hidden_size)

    w_hid, b_hid = [], []
    for l in range(n_hidden_layers):
        w, b = linear(keys[1 + l], hidden_size, hidden_size)
        w_hid.append(w)
        b_hid.append(b)
    w_hid = jnp.stack(w_hid, axis=0)                    # (L, H, H)
    b_hid = jnp.stack(b_hid, axis=0)                    # (L, 1, H)

    w_out, b_out = linear(keys[-1], hidden_size, out_size)
    return dict(w_in=w_in, b_in=b_in, w_hid=w_hid, b_hid=b_hid,
                w_out=w_out, b_out=b_out)


def discriminator_forward(comp, prop, params, *, n_hidden_layers,
                          tile_b=None, use_bf16_matmul=True):
    B, comp_d = comp.shape
    Bp, prop_d = prop.shape
    assert Bp == B
    hidden = params["w_in"].shape[1]
    out_size = params["w_out"].shape[1]
    assert n_hidden_layers >= 1
    # TODO(synk): n_hidden_layers == 0 would need a kernel variant without the
    # stacked hidden-weight input (zero-sized pallas inputs are not supported).

    mxu_dtype = jnp.bfloat16 if use_bf16_matmul else jnp.float32

    # ---- batch tiling: big tiles amortize per-grid-step overhead; pad remainder.
    if tile_b is None:
        tile_b = min(_round_up(B, 8), 1024)
    tile_b = _round_up(tile_b, 8)
    B_pad = _round_up(B, tile_b)
    if B_pad != B:
        pad = B_pad - B
        comp = jnp.pad(comp, ((0, pad), (0, 0)))
        prop = jnp.pad(prop, ((0, pad), (0, 0)))
    grid = (B_pad // tile_b,)

    # ---- pad hidden width to a 128-lane multiple (exact: padded cols stay 0).
    H_pad = _round_up(hidden, 128)

    def pad_last(a):
        return jnp.pad(a, [(0, 0)] * (a.ndim - 1) + [(0, H_pad - a.shape[-1])])

    w_in = params["w_in"]
    w_comp = pad_last(w_in[:comp_d]).astype(mxu_dtype)            # (comp_d, H_pad)
    w_prop = pad_last(w_in[comp_d:]).astype(mxu_dtype)            # (prop_d, H_pad)
    b_in = pad_last(params["b_in"]).astype(jnp.float32)           # (1, H_pad)
    w_hid = jnp.pad(params["w_hid"],
                    ((0, 0), (0, H_pad - hidden), (0, H_pad - hidden))
                    ).astype(mxu_dtype)                           # (L, H_pad, H_pad)
    b_hid = pad_last(params["b_hid"]).astype(jnp.float32)         # (L, 1, H_pad)
    w_out = jnp.pad(params["w_out"],
                    ((0, H_pad - hidden), (0, 0))).astype(mxu_dtype)  # (H_pad, out)
    b_out = params["b_out"].astype(jnp.float32)                   # (1, out)

    kernel = functools.partial(discriminator_kernel,
                               n_hidden_layers=n_hidden_layers,
                               mxu_dtype=mxu_dtype)

    row = lambda shape: pl.BlockSpec(shape, lambda i: (i, 0))      # batch-tiled
    rep2 = lambda shape: pl.BlockSpec(shape, lambda i: (0, 0))     # replicated
    rep3 = lambda shape: pl.BlockSpec(shape, lambda i: (0, 0, 0))  # replicated

    out = pl.pallas_call(
        kernel,
        out_shape=jax.ShapeDtypeStruct((B_pad, out_size), jnp.float32),
        grid_spec=pltpu.PrefetchScalarGridSpec(
            num_scalar_prefetch=0,
            grid=grid,
            in_specs=[
                row((tile_b, comp_d)),                             # comp
                row((tile_b, prop_d)),                             # prop
                rep2((comp_d, H_pad)),                             # w_in[:comp_d]
                rep2((prop_d, H_pad)),                             # w_in[comp_d:]
                rep2((1, H_pad)),                                  # b_in
                rep3((n_hidden_layers, H_pad, H_pad)),             # w_hid
                rep3((n_hidden_layers, 1, H_pad)),                 # b_hid
                rep2((H_pad, out_size)),                           # w_out
                rep2((1, out_size)),                               # b_out
            ],
            out_specs=row((tile_b, out_size)),
        ),
        compiler_params=pltpu.CompilerParams(
            # parallel batch axis: shards across v7x's 2 TensorCores, no-op on
            # v5e/v6e. Weight footprint here is tiny, so default VMEM limits
            # and default double-buffering are comfortably within budget.
            dimension_semantics=("parallel",)),
    )(comp, prop, w_comp, w_prop, b_in, w_hid, b_hid, w_out, b_out)

    return out[:B]


def discriminator_reference(comp, prop, params, *, n_hidden_layers):
    x = jnp.concatenate([comp, prop], axis=-1)
    h = _leaky_relu(x @ params["w_in"] + params["b_in"])
    for l in range(n_hidden_layers):
        h = _leaky_relu(h @ params["w_hid"][l] + params["b_hid"][l])
    return jax.nn.sigmoid(h @ params["w_out"] + params["b_out"])


if __name__ == "__main__":
    # Discriminator(in_size=32, n_hidden_layers=2, hidden_size=64, out_size=1)
    # forward(comp, prop) with comp: (B, 16), prop: (B, 16)  ->  (B, 1)
    B = 16
    comp_d, prop_d = 16, 16
    in_size = comp_d + prop_d
    n_hidden_layers = 2
    hidden_size = 64
    out_size = 1

    key = jax.random.PRNGKey(0)
    k_comp, k_prop, k_params = jax.random.split(key, 3)
    comp = jax.random.normal(k_comp, (B, comp_d), jnp.float32)
    prop = jax.random.normal(k_prop, (B, prop_d), jnp.float32)

    params = make_discriminator_params(k_params, in_size, n_hidden_layers,
                                       hidden_size, out_size)

    ref = discriminator_reference(comp, prop, params,
                                  n_hidden_layers=n_hidden_layers)

    # Exact-path check (f32 MXU inputs) — validates kernel structure/padding.
    out_f32 = discriminator_forward(comp, prop, params,
                                    n_hidden_layers=n_hidden_layers,
                                    use_bf16_matmul=False)
    out_f32 = jax.block_until_ready(out_f32)
    assert out_f32.shape == (B, out_size)
    assert jnp.allclose(out_f32, ref, atol=1e-5, rtol=1e-5)

    # Default fast path (bf16 MXU inputs, f32 accumulation/elementwise).
    out_bf16 = discriminator_forward(comp, prop, params,
                                     n_hidden_layers=n_hidden_layers)
    out_bf16 = jax.block_until_ready(out_bf16)
    assert out_bf16.shape == (B, out_size)
    assert jnp.allclose(out_bf16, ref, atol=2e-2, rtol=2e-2)

    print("KERNEL_OK")
</pallas_src>

<mosaic_0001>
module attributes {stable_mosaic.version = 11 : i64} {
  func.func @discriminator_kernel(%arg0: i32, %arg1: memref<16x16xf32, #tpu.memory_space<vmem>>, %arg2: memref<16x16xf32, #tpu.memory_space<vmem>>, %arg3: memref<16x128xf32, #tpu.memory_space<vmem>>, %arg4: memref<16x128xf32, #tpu.memory_space<vmem>>, %arg5: memref<1x128xf32, #tpu.memory_space<vmem>>, %arg6: memref<2x128x128xf32, #tpu.memory_space<vmem>>, %arg7: memref<2x1x128xf32, #tpu.memory_space<vmem>>, %arg8: memref<128x1xf32, #tpu.memory_space<vmem>>, %arg9: memref<1x1xf32, #tpu.memory_space<vmem>>, %arg10: memref<16x1xf32, #tpu.memory_space<vmem>>) attributes {dimension_semantics = [#tpu.dimension_semantics<parallel>], iteration_bounds = array<i64: 1>, scalar_prefetch = 0 : i64, scratch_operands = 0 : i64, tpu.core_type = #tpu.core_type<tc>, window_params = [{transform_indices = @transform_0, window_bounds = array<i64: 16, 16>}, {transform_indices = @transform_1, window_bounds = array<i64: 16, 16>}, {pipeline_mode = #tpu.pipeline_mode<synchronous>, transform_indices = @transform_2, window_bounds = array<i64: 16, 128>}, {pipeline_mode = #tpu.pipeline_mode<synchronous>, transform_indices = @transform_3, window_bounds = array<i64: 16, 128>}, {pipeline_mode = #tpu.pipeline_mode<synchronous>, transform_indices = @transform_4, window_bounds = array<i64: 1, 128>}, {pipeline_mode = #tpu.pipeline_mode<synchronous>, transform_indices = @transform_5, window_bounds = array<i64: 2, 128, 128>}, {pipeline_mode = #tpu.pipeline_mode<synchronous>, transform_indices = @transform_6, window_bounds = array<i64: 2, 1, 128>}, {pipeline_mode = #tpu.pipeline_mode<synchronous>, transform_indices = @transform_7, window_bounds = array<i64: 128, 1>}, {pipeline_mode = #tpu.pipeline_mode<synchronous>, transform_indices = @transform_8, window_bounds = array<i64: 1, 1>}, {transform_indices = @transform_9, window_bounds = array<i64: 16, 1>}]} {
    %c0 = arith.constant 0 : index
    %c0_0 = arith.constant 0 : index
    %0 = vector.load %arg1[%c0, %c0_0] : memref<16x16xf32, #tpu.memory_space<vmem>>, vector<16x16xf32>
    %c0_1 = arith.constant 0 : index
    %c0_2 = arith.constant 0 : index
    %1 = vector.load %arg3[%c0_1, %c0_2] : memref<16x128xf32, #tpu.memory_space<vmem>>, vector<16x128xf32>
    %cst = arith.constant dense<0.000000e+00> : vector<16x128xf32>
    %2 = tpu.matmul %0, %1, %cst {dimension_numbers = #tpu.dot_dimension_numbers<[1], [0], [0], [1], [0, 0, 1, 1], [], []>} : vector<16x16xf32>, vector<16x128xf32>, vector<16x128xf32> -> vector<16x128xf32>
    %c0_3 = arith.constant 0 : index
    %c0_4 = arith.constant 0 : index
    %3 = vector.load %arg2[%c0_3, %c0_4] : memref<16x16xf32, #tpu.memory_space<vmem>>, vector<16x16xf32>
    %c0_5 = arith.constant 0 : index
    %c0_6 = arith.constant 0 : index
    %4 = vector.load %arg4[%c0_5, %c0_6] : memref<16x128xf32, #tpu.memory_space<vmem>>, vector<16x128xf32>
    %cst_7 = arith.constant dense<0.000000e+00> : vector<16x128xf32>
    %5 = tpu.matmul %3, %4, %cst_7 {dimension_numbers = #tpu.dot_dimension_numbers<[1], [0], [0], [1], [0, 0, 1, 1], [], []>} : vector<16x16xf32>, vector<16x128xf32>, vector<16x128xf32> -> vector<16x128xf32>
    %6 = arith.addf %2, %5 : vector<16x128xf32>
    %c0_8 = arith.constant 0 : index
    %c0_9 = arith.constant 0 : index
    %7 = vector.load %arg5[%c0_8, %c0_9] : memref<1x128xf32, #tpu.memory_space<vmem>>, vector<1x128xf32>
    %8 = vector.broadcast %7 : vector<1x128xf32> to vector<16x128xf32>
    %9 = arith.addf %6, %8 : vector<16x128xf32>
    %cst_10 = arith.constant 0.000000e+00 : f32
    %10 = vector.broadcast %cst_10 : f32 to vector<16x128xf32>
    %11 = arith.cmpf ogt, %9, %10 : vector<16x128xf32>
    %cst_11 = arith.constant 2.000000e-01 : f32
    %12 = vector.broadcast %cst_11 : f32 to vector<16x128xf32>
    %13 = arith.mulf %12, %9 : vector<16x128xf32>
    %14 = arith.select %11, %9, %13 : vector<16x128xi1>, vector<16x128xf32>
    %c0_12 = arith.constant 0 : index
    %c0_13 = arith.constant 0 : index
    %c0_14 = arith.constant 0 : index
    %15 = vector.load %arg6[%c0_12, %c0_13, %c0_14] : memref<2x128x128xf32, #tpu.memory_space<vmem>>, vector<1x128x128xf32>
    %16 = vector.shape_cast %15 : vector<1x128x128xf32> to vector<128x128xf32>
    %cst_15 = arith.constant dense<0.000000e+00> : vector<16x128xf32>
    %17 = tpu.matmul %14, %16, %cst_15 {dimension_numbers = #tpu.dot_dimension_numbers<[1], [0], [0], [1], [0, 0, 1, 1], [], []>} : vector<16x128xf32>, vector<128x128xf32>, vector<16x128xf32> -> vector<16x128xf32>
    %c0_16 = arith.constant 0 : index
    %c0_17 = arith.constant 0 : index
    %c0_18 = arith.constant 0 : index
    %18 = vector.load %arg7[%c0_16, %c0_17, %c0_18] : memref<2x1x128xf32, #tpu.memory_space<vmem>>, vector<1x1x128xf32>
    %19 = vector.shape_cast %18 : vector<1x1x128xf32> to vector<1x128xf32>
    %20 = vector.broadcast %19 : vector<1x128xf32> to vector<16x128xf32>
    %21 = arith.addf %17, %20 : vector<16x128xf32>
    %cst_19 = arith.constant 0.000000e+00 : f32
    %22 = vector.broadcast %cst_19 : f32 to vector<16x128xf32>
    %23 = arith.cmpf ogt, %21, %22 : vector<16x128xf32>
    %cst_20 = arith.constant 2.000000e-01 : f32
    %24 = vector.broadcast %cst_20 : f32 to vector<16x128xf32>
    %25 = arith.mulf %24, %21 : vector<16x128xf32>
    %26 = arith.select %23, %21, %25 : vector<16x128xi1>, vector<16x128xf32>
    %c1 = arith.constant 1 : index
    %c0_21 = arith.constant 0 : index
    %c0_22 = arith.constant 0 : index
    %27 = vector.load %arg6[%c1, %c0_21, %c0_22] : memref<2x128x128xf32, #tpu.memory_space<vmem>>, vector<1x128x128xf32>
    %28 = vector.shape_cast %27 : vector<1x128x128xf32> to vector<128x128xf32>
    %cst_23 = arith.constant dense<0.000000e+00> : vector<16x128xf32>
    %29 = tpu.matmul %26, %28, %cst_23 {dimension_numbers = #tpu.dot_dimension_numbers<[1], [0], [0], [1], [0, 0, 1, 1], [], []>} : vector<16x128xf32>, vector<128x128xf32>, vector<16x128xf32> -> vector<16x128xf32>
    %c1_24 = arith.constant 1 : index
    %c0_25 = arith.constant 0 : index
    %c0_26 = arith.constant 0 : index
    %30 = vector.load %arg7[%c1_24, %c0_25, %c0_26] : memref<2x1x128xf32, #tpu.memory_space<vmem>>, vector<1x1x128xf32>
    %31 = vector.shape_cast %30 : vector<1x1x128xf32> to vector<1x128xf32>
    %32 = vector.broadcast %31 : vector<1x128xf32> to vector<16x128xf32>
    %33 = arith.addf %29, %32 : vector<16x128xf32>
    %cst_27 = arith.constant 0.000000e+00 : f32
    %34 = vector.broadcast %cst_27 : f32 to vector<16x128xf32>
    %35 = arith.cmpf ogt, %33, %34 : vector<16x128xf32>
    %cst_28 = arith.constant 2.000000e-01 : f32
    %36 = vector.broadcast %cst_28 : f32 to vector<16x128xf32>
    %37 = arith.mulf %36, %33 : vector<16x128xf32>
    %38 = arith.select %35, %33, %37 : vector<16x128xi1>, vector<16x128xf32>
    %c0_29 = arith.constant 0 : index
    %c0_30 = arith.constant 0 : index
    %39 = vector.load %arg8[%c0_29, %c0_30] : memref<128x1xf32, #tpu.memory_space<vmem>>, vector<128x1xf32>
    %cst_31 = arith.constant dense<0.000000e+00> : vector<16x1xf32>
    %40 = tpu.matmul %38, %39, %cst_31 {dimension_numbers = #tpu.dot_dimension_numbers<[1], [0], [0], [1], [0, 0, 1, 1], [], []>} : vector<16x128xf32>, vector<128x1xf32>, vector<16x1xf32> -> vector<16x1xf32>
    %c0_32 = arith.constant 0 : index
    %c0_33 = arith.constant 0 : index
    %41 = vector.load %arg9[%c0_32, %c0_33] : memref<1x1xf32, #tpu.memory_space<vmem>>, vector<1x1xf32>
    %42 = vector.broadcast %41 : vector<1x1xf32> to vector<16x1xf32>
    %43 = arith.addf %40, %42 : vector<16x1xf32>
    %44 = arith.negf %43 : vector<16x1xf32>
    %45 = math.exp %44 : vector<16x1xf32>
    %cst_34 = arith.constant 1.000000e+00 : f32
    %46 = vector.broadcast %cst_34 : f32 to vector<16x1xf32>
    %47 = arith.addf %46, %45 : vector<16x1xf32>
    %48 = arith.divf %46, %47 : vector<16x1xf32>
    %c0_35 = arith.constant 0 : index
    %c0_36 = arith.constant 0 : index
    %49 = vector.load %arg10[%c0_35, %c0_36] : memref<16x1xf32, #tpu.memory_space<vmem>>, vector<16x1xf32>
    tpu.vector_store %arg10[%c0_35, %c0_36], %48 {strides = array<i32>} : memref<16x1xf32, #tpu.memory_space<vmem>>, vector<16x1xf32>,
    return
  }
  func.func @transform_0(%arg0: i32) -> (i32, i32) {
    %c0_i32 = arith.constant 0 : i32
    %c0_i32_0 = arith.constant 0 : i32
    return %arg0, %c0_i32 : i32, i32
  }
  func.func @transform_1(%arg0: i32) -> (i32, i32) {
    %c0_i32 = arith.constant 0 : i32
    %c0_i32_0 = arith.constant 0 : i32
    return %arg0, %c0_i32 : i32, i32
  }
  func.func @transform_2(%arg0: i32) -> (i32, i32) {
    %c0_i32 = arith.constant 0 : i32
    %c0_i32_0 = arith.constant 0 : i32
    %c0_i32_1 = arith.constant 0 : i32
    return %c0_i32, %c0_i32_0 : i32, i32
  }
  func.func @transform_3(%arg0: i32) -> (i32, i32) {
    %c0_i32 = arith.constant 0 : i32
    %c0_i32_0 = arith.constant 0 : i32
    %c0_i32_1 = arith.constant 0 : i32
    return %c0_i32, %c0_i32_0 : i32, i32
  }
  func.func @transform_4(%arg0: i32) -> (i32, i32) {
    %c0_i32 = arith.constant 0 : i32
    %c0_i32_0 = arith.constant 0 : i32
    %c0_i32_1 = arith.constant 0 : i32
    return %c0_i32, %c0_i32_0 : i32, i32
  }
  func.func @transform_5(%arg0: i32) -> (i32, i32, i32) {
    %c0_i32 = arith.constant 0 : i32
    %c0_i32_0 = arith.constant 0 : i32
    %c0_i32_1 = arith.constant 0 : i32
    %c0_i32_2 = arith.constant 0 : i32
    return %c0_i32, %c0_i32_0, %c0_i32_1 : i32, i32, i32
  }
  func.func @transform_6(%arg0: i32) -> (i32, i32, i32) {
    %c0_i32 = arith.constant 0 : i32
    %c0_i32_0 = arith.constant 0 : i32
    %c0_i32_1 = arith.constant 0 : i32
    %c0_i32_2 = arith.constant 0 : i32
    return %c0_i32, %c0_i32_0, %c0_i32_1 : i32, i32, i32
  }
  func.func @transform_7(%arg0: i32) -> (i32, i32) {
    %c0_i32 = arith.constant 0 : i32
    %c0_i32_0 = arith.constant 0 : i32
    %c0_i32_1 = arith.constant 0 : i32
    return %c0_i32, %c0_i32_0 : i32, i32
  }
  func.func @transform_8(%arg0: i32) -> (i32, i32) {
    %c0_i32 = arith.constant 0 : i32
    %c0_i32_0 = arith.constant 0 : i32
    %c0_i32_1 = arith.constant 0 : i32
    return %c0_i32, %c0_i32_0 : i32, i32
  }
  func.func @transform_9(%arg0: i32) -> (i32, i32) {
    %c0_i32 = arith.constant 0 : i32
    %c0_i32_0 = arith.constant 0 : i32
    return %arg0, %c0_i32 : i32, i32
  }
}

</mosaic_0001>

<bundles_post_ra>
// kernel: tpu_custom_call.1
= control target key start
LH: loop header
LB: loop body
LE: loop exit
PB: predicated region body
PF: predicated region fallthrough
CT: control target
= control target key end

     0   :  { %s534_s0 = inlined_call_operand.vmem [shape: f32[16,16], index: 0, kind: input, shape index: {}]   ;;  %s535_s1 = inlined_call_operand.vmem [shape: f32[16,16], index: 1, kind: input, shape index: {}]   ;;  %s536_s2 = inlined_call_operand.vmem [shape: f32[16,128], index: 2, kind: input, shape index: {}]   ;;  %s537_s3 = inlined_call_operand.vmem [shape: f32[16,128], index: 3, kind: input, shape index: {}]   ;;  %s538_s4 = inlined_call_operand.vmem [shape: f32[1,128], index: 4, kind: input, shape index: {}]   ;;  %s539_s5 = inlined_call_operand.hbm [shape: f32[2,128,128], index: 5, kind: input, shape index: {}]   ;;  %s540_s6 = inlined_call_operand.vmem [shape: f32[2,1,128], index: 6, kind: input, shape index: {}]   ;;  %s541_s7 = inlined_call_operand.vmem [shape: f32[128,1], index: 7, kind: input, shape index: {}]   ;;  %s542_s8 = inlined_call_operand.<no memory space> [shape: f32[1,1], index: 8, kind: input, shape index: {}]   ;;  %s543_s9 = inlined_call_operand.vmem [shape: f32[16,1], index: 9, kind: output, shape index: {}]  }
   0x1   :  { %v14_v0 = vstv %s542_s8 }
   0x2   :  { %15 = vst [vmem:[#allocation2] sm:$0x1] %v14_v0 }
   0x3   :  { %16 = vsyncpa [#allocation4], 0  ;;  %s31_s13 = sshll.u32 %s539_s5, 4  ;;  %s382_s14 = smov [#allocation3]   ;;  %s32_s13 = int_to_ptr.hbm [resolvable:$true] %s31_s13 }
   0x4   :  { %s33_s15 = sshll.u32 %s382_s14, 4  ;;  %s383_s16 = smov 128   ;;  %s34_s15 = int_to_ptr.vmem [resolvable:$true] %s33_s15 }
   0x5   :  { %s384_s17 = smov 8  }
   0x6   :  { %39 = dma.hbm_to_vmem [thread:$0]  %s32_s13, 4096, %s34_s15, [#allocation4], %s383_s16, %s383_s16, %s384_s17  }
   0x7   :  { %380 = dma.done.wait [#allocation4], 4096  }
   0x8   :  { %381 = vsyncadd [#allocation4], 4294963200  ;;  %v57_v1 = vld [vmem:[%s537_s3 + $0x8] sm:$0xff]  ;;  %v56_v3 = vld [vmem:[%s537_s3] sm:$0xff]  ;;  %vm58_vm0 = vcmask 130048   ;;  %vm310_vm10 = vcmask 7168  }
   0x9   :  { %v53_v2 = vld [vmem:[%s536_s2 + $0x8] sm:$0xff]  ;;  %79 = vmatpush.msra.mxu0 %v57_v1  ;;  %v52_v4 = vld [vmem:[%s536_s2] sm:$0xff]  ;;  %v143_v8 = vld [vmem:[#allocation3 + $0x70] sm:$0xff] }
   0xa   :  { %108 = vmatpush.msra.mxu1 %v53_v2  ;;  %v54_v5 = vld [vmem:[%s535_s1] sm:$0xff]  ;;  %v142_v9 = vld [vmem:[#allocation3 + $0x68] sm:$0xff]  ;;  %v139_v14 = vld [vmem:[#allocation3 + $0x50] sm:$0xff] }
   0xb   :  { %v50_v6 = vld [vmem:[%s534_s0] sm:$0xff]  ;;  %80 = vmatpush.msra.mxu0 %v56_v3  ;;  %v55_v11 = vld [vmem:[%s535_s1 + $0x8] sm:$0xff]  ;;  %v135_v18 = vld [vmem:[#allocation3 + $0x30] sm:$0xff] }
   0xc   :  { %v144_v7 = vld [vmem:[#allocation3 + $0x78] sm:$0xff]  ;;  %109 = vmatpush.msra.mxu1 %v52_v4  ;;  %318 = vmatmul.msk.f32.vlgmr.msra.gmra.mxu0 %vm58_vm0, %v54_v5  ;;  %v141_v10 = vld [vmem:[#allocation3 + $0x60] sm:$0xff]  ;;  %v138_v15 = vld [vmem:[#allocation3 + $0x48] sm:$0xff] }
   0xd   :  { %320 = vmatmul.msk.f32.vlgmr.msra.gmra.mxu1 %vm58_vm0, %v50_v6  ;;  %149 = vmatpush.msra.mxu2 %v144_v7  ;;  %v51_v12 = vld [vmem:[%s534_s0 + $0x8] sm:$0xff]  ;;  %v140_v13 = vld [vmem:[#allocation3 + $0x58] sm:$0xff]  ;;  %v131_v22 = vld [vmem:[#allocation3 + $0x10] sm:$0xff] }
   0xe   :  { %v137_v16 = vld [vmem:[#allocation3 + $0x40] sm:$0xff]  ;;  %v136_v17 = vld [vmem:[#allocation3 + $0x38] sm:$0xff]  ;;  %v134_v19 = vld [vmem:[#allocation3 + $0x28] sm:$0xff] }
   0xf   :  { %150 = vmatpush.msra.mxu2 %v143_v8  ;;  %v133_v20 = vld [vmem:[#allocation3 + $0x20] sm:$0xff]  ;;  %v132_v21 = vld [vmem:[#allocation3 + $0x18] sm:$0xff]  ;;  %v130_v23 = vld [vmem:[#allocation3 + $0x8] sm:$0xff] }
  0x10   :  { %v129_v24 = vld [vmem:[#allocation3] sm:$0xff]  ;;  %v194_v25 = vld [vmem:[#allocation3 + $0xf8] sm:$0xff]  ;;  %v193_v26 = vld [vmem:[#allocation3 + $0xf0] sm:$0xff] }
  0x11   :  { %151 = vmatpush.msra.mxu2 %v142_v9  ;;  %200 = vmatpush.msra.mxu3 %v194_v25  ;;  %v192_v27 = vld [vmem:[#allocation3 + $0xe8] sm:$0xff]  ;;  %v191_v28 = vld [vmem:[#allocation3 + $0xe0] sm:$0xff]  ;;  %v190_v29 = vld [vmem:[#allocation3 + $0xd8] sm:$0xff] }
  0x12   :  { %v189_v30 = vld [vmem:[#allocation3 + $0xd0] sm:$0xff]  ;;  %v188_v31 = vld [vmem:[#allocation3 + $0xc8] sm:$0xff]  ;;  %v187_v32 = vld [vmem:[#allocation3 + $0xc0] sm:$0xff] }
  0x13   :  { %152 = vmatpush.msra.mxu2 %v141_v10  ;;  %201 = vmatpush.msra.mxu3 %v193_v26  ;;  %v186_v33 = vld [vmem:[#allocation3 + $0xb8] sm:$0xff]  ;;  %v185_v37 = vld [vmem:[#allocation3 + $0xb0] sm:$0xff]  ;;  %v184_v39 = vld [vmem:[#allocation3 + $0xa8] sm:$0xff] }
  0x14   :  { %319 = vmatmul.msk.f32.gmra.mxu0 %vm58_vm0, %v55_v11  ;;  %v344_v34 = vld [vmem:[%s538_s4] ss:$0 sm:$0xff]  ;;  %v183_v41 = vld [vmem:[#allocation3 + $0xa0] sm:$0xff]  ;;  %v181_v51 = vld [vmem:[#allocation3 + $0x90] sm:$0xff] }
  0x15   :  { %321 = vmatmul.msk.f32.gmra.mxu1 %vm58_vm0, %v51_v12  ;;  %153 = vmatpush.msra.mxu2 %v140_v13  ;;  %v182_v43 = vld [vmem:[#allocation3 + $0x98] sm:$0xff]  ;;  %v180_v52 = vld [vmem:[#allocation3 + $0x88] sm:$0xff]  ;;  %v179_v53 = vld [vmem:[#allocation3 + $0x80] sm:$0xff] }
  0x16   :  { %202 = vmatpush.msra.mxu3 %v192_v27  ;;  %v244_v54 = vld [vmem:[%s541_s7 + $0x78] sm:$0xff]  ;;  %v243_v55 = vld [vmem:[%s541_s7 + $0x70] sm:$0xff]  ;;  %v242_v56 = vld [vmem:[%s541_s7 + $0x68] sm:$0xff] }
  0x17   :  { %154 = vmatpush.msra.mxu2 %v139_v14  ;;  %249 = vmatpush.msrb.mxu0 %v244_v54  ;;  %v241_v57 = vld [vmem:[%s541_s7 + $0x60] sm:$0xff]  ;;  %v240_v58 = vld [vmem:[%s541_s7 + $0x58] sm:$0xff]  ;;  %v239_v59 = vld [vmem:[%s541_s7 + $0x50] sm:$0xff] }
  0x18   :  { %203 = vmatpush.msra.mxu3 %v191_v28  ;;  %325 = vmatpush.msrb.mxu1 %v244_v54  ;;  %v238_v60 = vld [vmem:[%s541_s7 + $0x48] sm:$0xff]  ;;  %v237_v61 = vld [vmem:[%s541_s7 + $0x40] sm:$0xff]  ;;  %v236_v62 = vld [vmem:[%s541_s7 + $0x38] sm:$0xff] }
  0x19   :  { %155 = vmatpush.msra.mxu2 %v138_v15  ;;  %250 = vmatpush.msrb.mxu0 %v243_v55  ;;  %v345_v63 = vld [vmem:[%s540_s6] ss:$0 sm:$0xff]  ;;  %v235_v0 = vld [vmem:[%s541_s7 + $0x30] sm:$0xff]  ;;  %v234_v2 = vld [vmem:[%s541_s7 + $0x28] sm:$0xff] }
  0x1a   :  { %204 = vmatpush.msra.mxu3 %v190_v29  ;;  %326 = vmatpush.msrb.mxu1 %v243_v55  ;;  %v233_v4 = vld [vmem:[%s541_s7 + $0x20] sm:$0xff]  ;;  %v232_v6 = vld [vmem:[%s541_s7 + $0x18] sm:$0xff]  ;;  %v231_v12 = vld [vmem:[%s541_s7 + $0x10] sm:$0xff] }
  0x1b   :  { %156 = vmatpush.msra.mxu2 %v137_v16  ;;  %251 = vmatpush.msrb.mxu0 %v242_v56  ;;  %v230_v13 = vld [vmem:[%s541_s7 + $0x8] sm:$0xff]  ;;  %v229_v14 = vld [vmem:[%s541_s7] sm:$0xff] }
  0x1c   :  { %205 = vmatpush.msra.mxu3 %v189_v30  ;;  %327 = vmatpush.msrb.mxu1 %v242_v56  ;;  %v346_v15 = vld [vmem:[%s540_s6 + $0x1] ss:$0 sm:$0xff] }
  0x1d   :  { %157 = vmatpush.msra.mxu2 %v136_v17  ;;  %252 = vmatpush.msrb.mxu0 %v241_v57 }
  0x1e   :  { %206 = vmatpush.msra.mxu3 %v188_v31  ;;  %328 = vmatpush.msrb.mxu1 %v241_v57 }
  0x1f   :  { %158 = vmatpush.msra.mxu2 %v135_v18  ;;  %253 = vmatpush.msrb.mxu0 %v240_v58 }
  0x20   :  { %207 = vmatpush.msra.mxu3 %v187_v32  ;;  %329 = vmatpush.msrb.mxu1 %v240_v58 }
  0x21   :  { %159 = vmatpush.msra.mxu2 %v134_v19  ;;  %254 = vmatpush.msrb.mxu0 %v239_v59 }
  0x22   :  { %208 = vmatpush.msra.mxu3 %v186_v33  ;;  %330 = vmatpush.msrb.mxu1 %v239_v59 }
  0x23   :  { %160 = vmatpush.msra.mxu2 %v133_v20  ;;  %255 = vmatpush.msrb.mxu0 %v238_v60 }
  0x24   :  { %209 = vmatpush.msra.mxu3 %v185_v37  ;;  %331 = vmatpush.msrb.mxu1 %v238_v60 }
  0x25   :  { %161 = vmatpush.msra.mxu2 %v132_v21  ;;  %256 = vmatpush.msrb.mxu0 %v237_v61 }
  0x26   :  { %210 = vmatpush.msra.mxu3 %v184_v39  ;;  %332 = vmatpush.msrb.mxu1 %v237_v61 }
  0x27   :  { %162 = vmatpush.msra.mxu2 %v131_v22  ;;  %257 = vmatpush.msrb.mxu0 %v236_v62 }
  0x28   :  { %211 = vmatpush.msra.mxu3 %v183_v41  ;;  %333 = vmatpush.msrb.mxu1 %v236_v62 }
  0x29   :  { %163 = vmatpush.msra.mxu2 %v130_v23  ;;  %258 = vmatpush.msrb.mxu0 %v235_v0 }
  0x2a   :  { %212 = vmatpush.msra.mxu3 %v182_v43  ;;  %334 = vmatpush.msrb.mxu1 %v235_v0 }
  0x2b   :  { %164 = vmatpush.msra.mxu2 %v129_v24  ;;  %259 = vmatpush.msrb.mxu0 %v234_v2  ;;  %v347_v24 = vld [vmem:[#allocation2] ss:$0 sm:$0xff] }
  0x2c   :  { %213 = vmatpush.msra.mxu3 %v181_v51  ;;  %335 = vmatpush.msrb.mxu1 %v234_v2 }
  0x2d   :  { %260 = vmatpush.msrb.mxu0 %v233_v4 }
  0x2e   :  { %214 = vmatpush.msra.mxu3 %v180_v52  ;;  %336 = vmatpush.msrb.mxu1 %v233_v4 }
  0x2f   :  { %261 = vmatpush.msrb.mxu0 %v232_v6 }
  0x30   :  { %215 = vmatpush.msra.mxu3 %v179_v53  ;;  %337 = vmatpush.msrb.mxu1 %v232_v6 }
  0x31   :  { %262 = vmatpush.msrb.mxu0 %v231_v12 }
  0x32   :  { %338 = vmatpush.msrb.mxu1 %v231_v12 }
  0x33   :  { %263 = vmatpush.msrb.mxu0 %v230_v13 }
  0x34   :  { %339 = vmatpush.msrb.mxu1 %v230_v13 }
  0x35   :  { %264 = vmatpush.msrb.mxu0 %v229_v14 }
  0x36   :  { %340 = vmatpush.msrb.mxu1 %v229_v14 }
  0x89   :  { %v82_v35 = vpop.f32.mrf.mxu0 }
  0x8a   :  { %v111_v36 = vpop.f32.mrf.mxu1 }
  0x8b   :  { %v112_v38 = vadd.f32 %v111_v36, %v82_v35 }
  0x8d   :  { %v121_v40 = vadd.f32 %v344_v34, %v112_v38 }
  0x8f   :  { %vm123_vm1 = vcmp.gt.f32.partialorder %v121_v40, 0.0  ;;  %v125_v42 = vmul.f32 0.2, %v121_v40 }
  0x91   :  { %v127_v44 = vsel %vm123_vm1, %v121_v40, %v125_v42  ;;  %v85_v45 = vpop.f32.mrf.mxu0 }
  0x92   :  { %v114_v46 = vpop.f32.mrf.mxu1  ;;  %165 = vmatmul.f32.vlgmr.msra.gmra.mxu2 %v127_v44 }
  0x93   :  { %v115_v47 = vadd.f32 %v114_v46, %v85_v45 }
  0x95   :  { %v122_v48 = vadd.f32 %v344_v34, %v115_v47 }
  0x97   :  { %vm124_vm2 = vcmp.gt.f32.partialorder %v122_v48, 0.0  ;;  %v126_v49 = vmul.f32 0.2, %v122_v48 }
  0x99   :  { %v128_v50 = vsel %vm124_vm2, %v122_v48, %v126_v49 }
  0x9a   :  { %168 = vmatmul.f32.gmra.mxu2 %v128_v50 }
 0x115   :  { %v166_v1 = vpop.f32.mrf.mxu2 }
 0x116   :  { %v167_v3 = vadd.f32 %v345_v63, %v166_v1 }
 0x118   :  { %vm172_vm3 = vcmp.gt.f32.partialorder %v167_v3, 0.0  ;;  %v174_v5 = vmul.f32 0.2, %v167_v3 }
 0x11a   :  { %v176_v7 = vsel %vm172_vm3, %v167_v3, %v174_v5 }
 0x11b   :  { %216 = vmatmul.f32.vlgmr.msra.gmra.mxu3 %v176_v7 }
 0x11d   :  { %v169_v8 = vpop.f32.mrf.mxu2 }
 0x11e   :  { %v170_v9 = vadd.f32 %v345_v63, %v169_v8 }
 0x120   :  { %vm173_vm4 = vcmp.gt.f32.partialorder %v170_v9, 0.0  ;;  %v175_v10 = vmul.f32 0.2, %v170_v9 }
 0x122   :  { %v177_v11 = vsel %vm173_vm4, %v170_v9, %v175_v10 }
 0x123   :  { %219 = vmatmul.f32.gmra.mxu3 %v177_v11 }
 0x19e   :  { %v217_v16 = vpop.f32.mrf.mxu3 }
 0x19f   :  { %v218_v17 = vadd.f32 %v346_v15, %v217_v16 }
 0x1a1   :  { %v225_v18 = vmul.f32 0.2, %v218_v17  ;;  %vm223_vm5 = vcmp.gt.f32.partialorder %v218_v17, 0.0 }
 0x1a3   :  { %v227_v19 = vsel %vm223_vm5, %v218_v17, %v225_v18 }
 0x1a4   :  { %265 = vmatmul.f32.vlgmr.msrb.gmra.mxu0 %v227_v19 }
 0x1a6   :  { %v220_v20 = vpop.f32.mrf.mxu3 }
 0x1a7   :  { %v221_v21 = vadd.f32 %v346_v15, %v220_v20 }
 0x1a9   :  { %v226_v22 = vmul.f32 0.2, %v221_v21  ;;  %vm224_vm6 = vcmp.gt.f32.partialorder %v221_v21, 0.0 }
 0x1ab   :  { %v228_v23 = vsel %vm224_vm6, %v221_v21, %v226_v22 }
 0x1ac   :  { %268 = vmatmul.f32.vlgmr.msrb.gmra.mxu1 %v228_v23 }
 0x221   :  { %v266_v25 = vpop.f32.mrf.mxu0 }
 0x222   :  { %v267_v26 = vadd.f32 %v347_v24, %v266_v25 }
 0x224   :  { %v323_v27 = vmul.f32 -1.442695, %v267_v26 }
 0x226   :  { %348 = vpow2.f32 %v323_v27 }
 0x229   :  { %v269_v28 = vpop.f32.mrf.mxu1 }
 0x22a   :  { %v270_v29 = vadd.f32 %v347_v24, %v269_v28 }
 0x22c   :  { %v349_v30 = vpop.eup %348  ;;  %v324_v31 = vmul.f32 -1.442695, %v270_v29 }
 0x22d   :  { %v278_v32 = vadd.f32 1.0, %v349_v30 }
 0x22e   :  { %350 = vpow2.f32 %v324_v31 }
 0x22f   :  { %352 = vrcp.f32 %v278_v32  ;;  %v291_v38 = vand.u32 2147483648, %v278_v32  ;;  %v289_v40 = vand.u32 2147483647, %v278_v32  ;;  %vm285_vm8 = vweird.f32 %v278_v32 }
 0x231   :  { %v292_v43 = vor.u32 1.1754944e-38, %v291_v38  ;;  %vm290_vm11 = vcmp.eq.f32.partialorder %v289_v40, 8.507059e+37 }
 0x234   :  { %v351_v33 = vpop.eup %350 }
 0x235   :  { %v353_v34 = vpop.eup %352  ;;  %v279_v35 = vadd.f32 1.0, %v351_v33 }
 0x236   :  { %v281_v36 = vmul.f32 %v353_v34, %v278_v32  ;;  %vm286_vm7 = vweird.f32 %v353_v34 }
 0x237   :  { %354 = vrcp.f32 %v279_v35  ;;  %vm287_vm9 = vmor %vm285_vm8, %vm286_vm7  ;;  %v306_v48 = vand.u32 2147483648, %v279_v35  ;;  %v304_v50 = vand.u32 2147483647, %v279_v35  ;;  %vm300_vm13 = vweird.f32 %v279_v35 }
 0x238   :  { %v282_v37 = vsub.f32 1.0, %v281_v36 }
 0x239   :  { %v307_v52 = vor.u32 1.1754944e-38, %v306_v48  ;;  %vm305_vm15 = vcmp.eq.f32.partialorder %v304_v50, 8.507059e+37 }
 0x23a   :  { %v283_v39 = vmul.f32 %v353_v34, %v282_v37 }
 0x23c   :  { %v284_v41 = vadd.f32 %v353_v34, %v283_v39 }
 0x23d   :  { %v355_v42 = vpop.eup %354 }
 0x23e   :  { %v288_v44 = vsel %vm287_vm9, %v353_v34, %v284_v41  ;;  %v296_v45 = vmul.f32 %v355_v42, %v279_v35  ;;  %vm301_vm12 = vweird.f32 %v355_v42 }
 0x23f   :  { %v293_v46 = vsel %vm290_vm11, %v292_v43, %v288_v44  ;;  %vm302_vm14 = vmor %vm300_vm13, %vm301_vm12 }
 0x240   :  { %311 = vst.msk [vmem:[%s543_s9] sm:$0xff] %vm310_vm10, %v293_v46  ;;  %v297_v47 = vsub.f32 1.0, %v296_v45 }
 0x242   :  { %v298_v49 = vmul.f32 %v355_v42, %v297_v47 }
 0x244   :  { %v299_v51 = vadd.f32 %v355_v42, %v298_v49 }
 0x246   :  { %v303_v53 = vsel %vm302_vm14, %v355_v42, %v299_v51 }
 0x247   :  { %v308_v54 = vsel %vm305_vm15, %v307_v52, %v303_v53 }
 0x248   :  { %312 = vst.msk [vmem:[%s543_s9 + $0x8] sm:$0xff] %vm310_vm10, %v308_v54 }
 0x249   :  { %317 = vsyncpa [#allocation4], 1 }

</bundles_post_ra>
